<compile_context>
chip_gen: v5e
topology: v5e:2x2
jax: 0.10.0
libtpu: 0.0.40
codegen_flags: <defaults>
</compile_context>

<pallas_src>
import math

import jax
import jax.numpy as jnp
from jax.experimental import pallas as pl
from jax.experimental.pallas import tpu as pltpu

PAD = 128          # lane-dense feature padding (multiple of 128)
TB = 128           # batch tile (rows per grid step)
N_LAYERS = 4       # 3 hidden + 1 output


def _mlp_kernel(x_ref, w_ref, b_ref, out_ref):
    """Fused 3x(Linear+ReLU) + final Linear on one padded (TB, PAD) tile.

    x_ref  : (TB, PAD)        f32
    w_ref  : (N_LAYERS, PAD, PAD) bf16  (zero-padded, layer-stacked, (in,out))
    b_ref  : (N_LAYERS, 1, PAD)   f32  (zero-padded)
    out_ref: (TB, PAD)        f32
    """
    h = x_ref[...]                                    # f32 activations
    for l in range(N_LAYERS - 1):                     # static unroll (3 layers)
        h = jnp.dot(h.astype(jnp.bfloat16), w_ref[l],
                    preferred_element_type=jnp.float32) + b_ref[l]
        h = jnp.maximum(h, 0.0)
    y = jnp.dot(h.astype(jnp.bfloat16), w_ref[N_LAYERS - 1],
                preferred_element_type=jnp.float32) + b_ref[N_LAYERS - 1]
    out_ref[...] = y


def mlp_forward(x, w_slab, b_slab, action_dim):
    """x: (batch, obs_dim) f32.  w_slab: (L,PAD,PAD) bf16.  b_slab: (L,1,PAD) f32."""
    batch, obs_dim = x.shape
    pad_batch = pl.cdiv(batch, TB) * TB

    # Pad input to a lane-dense, batch-tiled slab (zeros in padded rows/cols).
    x_p = jnp.zeros((pad_batch, PAD), jnp.float32).at[:batch, :obs_dim].set(x)

    out_padded = pl.pallas_call(
        _mlp_kernel,
        out_shape=jax.ShapeDtypeStruct((pad_batch, PAD), jnp.float32),
        grid=(pad_batch // TB,),
        in_specs=[
            pl.BlockSpec((TB, PAD), lambda i: (i, 0)),                    # x tile
            pl.BlockSpec((N_LAYERS, PAD, PAD), lambda i: (0, 0, 0)),      # weights resident
            pl.BlockSpec((N_LAYERS, 1, PAD), lambda i: (0, 0, 0)),        # biases resident
        ],
        out_specs=pl.BlockSpec((TB, PAD), lambda i: (i, 0)),
        compiler_params=pltpu.CompilerParams(
            dimension_semantics=("parallel",)),                           # 2 TCs on v7x
    )(x_p, w_slab, b_slab)

    return out_padded[:batch, :action_dim]


def init_mlp_params(key, obs_dim, action_dim, hidden_dims=(32, 32)):
    """PyTorch-Linear-style init (U(-1/sqrt(fan_in), +)), packed into padded slabs.

    Weights stored transposed (in, out) so the kernel does y = x @ W + b.
    Padded rows/cols/bias entries are zero so relu(0) = 0 propagates cleanly
    and the final [:, :action_dim] slice is exact.
    """
    layer_dims = [
        (obs_dim, hidden_dims[0]),
        (hidden_dims[0], hidden_dims[0]),
        (hidden_dims[1], hidden_dims[1]),
        (hidden_dims[1], action_dim),
    ]
    assert len(layer_dims) == N_LAYERS
    w_slab = jnp.zeros((N_LAYERS, PAD, PAD), jnp.float32)
    b_slab = jnp.zeros((N_LAYERS, 1, PAD), jnp.float32)
    for l, (fan_in, fan_out) in enumerate(layer_dims):
        key, kw, kb = jax.random.split(key, 3)
        bound = 1.0 / math.sqrt(fan_in)
        w = jax.random.uniform(kw, (fan_in, fan_out), jnp.float32,
                               minval=-bound, maxval=bound)
        b = jax.random.uniform(kb, (1, fan_out), jnp.float32,
                               minval=-bound, maxval=bound)
        w_slab = w_slab.at[l, :fan_in, :fan_out].set(w)
        b_slab = b_slab.at[l, :, :fan_out].set(b)
    return w_slab.astype(jnp.bfloat16), b_slab


def mlp_reference(x, w_slab, b_slab, action_dim):
    """Plain-JAX reference with the identical precision path (bf16 operands,
    f32 accumulation) for a tight correctness check."""
    batch, obs_dim = x.shape
    h = jnp.zeros((batch, PAD), jnp.float32).at[:, :obs_dim].set(x)
    for l in range(N_LAYERS - 1):
        h = jnp.maximum(
            jnp.dot(h.astype(jnp.bfloat16), w_slab[l],
                    preferred_element_type=jnp.float32) + b_slab[l], 0.0)
    y = jnp.dot(h.astype(jnp.bfloat16), w_slab[N_LAYERS - 1],
                preferred_element_type=jnp.float32) + b_slab[N_LAYERS - 1]
    return y[:, :action_dim]


if __name__ == "__main__":
    key = jax.random.PRNGKey(0)
    key, kx = jax.random.split(key)

    batch, obs_dim, action_dim = 2, 8, 4
    hidden_dims = (32, 32)

    w_slab, b_slab = init_mlp_params(key, obs_dim, action_dim, hidden_dims)
    x = jax.random.normal(kx, (batch, obs_dim), jnp.float32)

    out = mlp_forward(x, w_slab, b_slab, action_dim)
    out = jax.block_until_ready(out)

    ref = mlp_reference(x, w_slab, b_slab, action_dim)
    assert out.shape == (batch, action_dim), out.shape
    assert jnp.allclose(out, ref, atol=1e-4, rtol=1e-4), (out, ref)

    print("KERNEL_OK")
</pallas_src>

<mosaic_0001>
module attributes {stable_mosaic.version = 11 : i64} {
  func.func @_mlp_kernel(%arg0: i32, %arg1: memref<128x128xf32, #tpu.memory_space<vmem>>, %arg2: memref<4x128x128xbf16, #tpu.memory_space<vmem>>, %arg3: memref<4x1x128xf32, #tpu.memory_space<vmem>>, %arg4: memref<128x128xf32, #tpu.memory_space<vmem>>) attributes {dimension_semantics = [#tpu.dimension_semantics<parallel>], iteration_bounds = array<i64: 1>, scalar_prefetch = 0 : i64, scratch_operands = 0 : i64, tpu.core_type = #tpu.core_type<tc>, window_params = [{transform_indices = @transform_0, window_bounds = array<i64: 128, 128>}, {pipeline_mode = #tpu.pipeline_mode<synchronous>, transform_indices = @transform_1, window_bounds = array<i64: 4, 128, 128>}, {pipeline_mode = #tpu.pipeline_mode<synchronous>, transform_indices = @transform_2, window_bounds = array<i64: 4, 1, 128>}, {transform_indices = @transform_3, window_bounds = array<i64: 128, 128>}]} {
    %c0 = arith.constant 0 : index
    %c0_0 = arith.constant 0 : index
    %0 = vector.load %arg1[%c0, %c0_0] : memref<128x128xf32, #tpu.memory_space<vmem>>, vector<128x128xf32>
    %1 = arith.truncf %0 : vector<128x128xf32> to vector<128x128xbf16>
    %c0_1 = arith.constant 0 : index
    %c0_2 = arith.constant 0 : index
    %c0_3 = arith.constant 0 : index
    %2 = vector.load %arg2[%c0_1, %c0_2, %c0_3] : memref<4x128x128xbf16, #tpu.memory_space<vmem>>, vector<1x128x128xbf16>
    %3 = vector.shape_cast %2 : vector<1x128x128xbf16> to vector<128x128xbf16>
    %cst = arith.constant dense<0.000000e+00> : vector<128x128xf32>
    %4 = tpu.matmul %1, %3, %cst {dimension_numbers = #tpu.dot_dimension_numbers<[1], [0], [0], [1], [0, 0, 1, 1], [], []>} : vector<128x128xbf16>, vector<128x128xbf16>, vector<128x128xf32> -> vector<128x128xf32>
    %c0_4 = arith.constant 0 : index
    %c0_5 = arith.constant 0 : index
    %c0_6 = arith.constant 0 : index
    %5 = vector.load %arg3[%c0_4, %c0_5, %c0_6] : memref<4x1x128xf32, #tpu.memory_space<vmem>>, vector<1x1x128xf32>
    %6 = vector.shape_cast %5 : vector<1x1x128xf32> to vector<1x128xf32>
    %7 = vector.broadcast %6 : vector<1x128xf32> to vector<128x128xf32>
    %8 = arith.addf %4, %7 : vector<128x128xf32>
    %cst_7 = arith.constant 0.000000e+00 : f32
    %9 = vector.broadcast %cst_7 : f32 to vector<128x128xf32>
    %10 = arith.maximumf %8, %9 : vector<128x128xf32>
    %11 = arith.truncf %10 : vector<128x128xf32> to vector<128x128xbf16>
    %c1 = arith.constant 1 : index
    %c0_8 = arith.constant 0 : index
    %c0_9 = arith.constant 0 : index
    %12 = vector.load %arg2[%c1, %c0_8, %c0_9] : memref<4x128x128xbf16, #tpu.memory_space<vmem>>, vector<1x128x128xbf16>
    %13 = vector.shape_cast %12 : vector<1x128x128xbf16> to vector<128x128xbf16>
    %cst_10 = arith.constant dense<0.000000e+00> : vector<128x128xf32>
    %14 = tpu.matmul %11, %13, %cst_10 {dimension_numbers = #tpu.dot_dimension_numbers<[1], [0], [0], [1], [0, 0, 1, 1], [], []>} : vector<128x128xbf16>, vector<128x128xbf16>, vector<128x128xf32> -> vector<128x128xf32>
    %c1_11 = arith.constant 1 : index
    %c0_12 = arith.constant 0 : index
    %c0_13 = arith.constant 0 : index
    %15 = vector.load %arg3[%c1_11, %c0_12, %c0_13] : memref<4x1x128xf32, #tpu.memory_space<vmem>>, vector<1x1x128xf32>
    %16 = vector.shape_cast %15 : vector<1x1x128xf32> to vector<1x128xf32>
    %17 = vector.broadcast %16 : vector<1x128xf32> to vector<128x128xf32>
    %18 = arith.addf %14, %17 : vector<128x128xf32>
    %cst_14 = arith.constant 0.000000e+00 : f32
    %19 = vector.broadcast %cst_14 : f32 to vector<128x128xf32>
    %20 = arith.maximumf %18, %19 : vector<128x128xf32>
    %21 = arith.truncf %20 : vector<128x128xf32> to vector<128x128xbf16>
    %c2 = arith.constant 2 : index
    %c0_15 = arith.constant 0 : index
    %c0_16 = arith.constant 0 : index
    %22 = vector.load %arg2[%c2, %c0_15, %c0_16] : memref<4x128x128xbf16, #tpu.memory_space<vmem>>, vector<1x128x128xbf16>
    %23 = vector.shape_cast %22 : vector<1x128x128xbf16> to vector<128x128xbf16>
    %cst_17 = arith.constant dense<0.000000e+00> : vector<128x128xf32>
    %24 = tpu.matmul %21, %23, %cst_17 {dimension_numbers = #tpu.dot_dimension_numbers<[1], [0], [0], [1], [0, 0, 1, 1], [], []>} : vector<128x128xbf16>, vector<128x128xbf16>, vector<128x128xf32> -> vector<128x128xf32>
    %c2_18 = arith.constant 2 : index
    %c0_19 = arith.constant 0 : index
    %c0_20 = arith.constant 0 : index
    %25 = vector.load %arg3[%c2_18, %c0_19, %c0_20] : memref<4x1x128xf32, #tpu.memory_space<vmem>>, vector<1x1x128xf32>
    %26 = vector.shape_cast %25 : vector<1x1x128xf32> to vector<1x128xf32>
    %27 = vector.broadcast %26 : vector<1x128xf32> to vector<128x128xf32>
    %28 = arith.addf %24, %27 : vector<128x128xf32>
    %cst_21 = arith.constant 0.000000e+00 : f32
    %29 = vector.broadcast %cst_21 : f32 to vector<128x128xf32>
    %30 = arith.maximumf %28, %29 : vector<128x128xf32>
    %31 = arith.truncf %30 : vector<128x128xf32> to vector<128x128xbf16>
    %c3 = arith.constant 3 : index
    %c0_22 = arith.constant 0 : index
    %c0_23 = arith.constant 0 : index
    %32 = vector.load %arg2[%c3, %c0_22, %c0_23] : memref<4x128x128xbf16, #tpu.memory_space<vmem>>, vector<1x128x128xbf16>
    %33 = vector.shape_cast %32 : vector<1x128x128xbf16> to vector<128x128xbf16>
    %cst_24 = arith.constant dense<0.000000e+00> : vector<128x128xf32>
    %34 = tpu.matmul %31, %33, %cst_24 {dimension_numbers = #tpu.dot_dimension_numbers<[1], [0], [0], [1], [0, 0, 1, 1], [], []>} : vector<128x128xbf16>, vector<128x128xbf16>, vector<128x128xf32> -> vector<128x128xf32>
    %c3_25 = arith.constant 3 : index
    %c0_26 = arith.constant 0 : index
    %c0_27 = arith.constant 0 : index
    %35 = vector.load %arg3[%c3_25, %c0_26, %c0_27] : memref<4x1x128xf32, #tpu.memory_space<vmem>>, vector<1x1x128xf32>
    %36 = vector.shape_cast %35 : vector<1x1x128xf32> to vector<1x128xf32>
    %37 = vector.broadcast %36 : vector<1x128xf32> to vector<128x128xf32>
    %38 = arith.addf %34, %37 : vector<128x128xf32>
    %c0_28 = arith.constant 0 : index
    %c0_29 = arith.constant 0 : index
    %39 = vector.load %arg4[%c0_28, %c0_29] : memref<128x128xf32, #tpu.memory_space<vmem>>, vector<128x128xf32>
    tpu.vector_store %arg4[%c0_28, %c0_29], %38 {strides = array<i32>} : memref<128x128xf32, #tpu.memory_space<vmem>>, vector<128x128xf32>,
    return
  }
  func.func @transform_0(%arg0: i32) -> (i32, i32) {
    %c0_i32 = arith.constant 0 : i32
    %c0_i32_0 = arith.constant 0 : i32
    return %arg0, %c0_i32 : i32, i32
  }
  func.func @transform_1(%arg0: i32) -> (i32, i32, i32) {
    %c0_i32 = arith.constant 0 : i32
    %c0_i32_0 = arith.constant 0 : i32
    %c0_i32_1 = arith.constant 0 : i32
    %c0_i32_2 = arith.constant 0 : i32
    return %c0_i32, %c0_i32_0, %c0_i32_1 : i32, i32, i32
  }
  func.func @transform_2(%arg0: i32) -> (i32, i32, i32) {
    %c0_i32 = arith.constant 0 : i32
    %c0_i32_0 = arith.constant 0 : i32
    %c0_i32_1 = arith.constant 0 : i32
    %c0_i32_2 = arith.constant 0 : i32
    return %c0_i32, %c0_i32_0, %c0_i32_1 : i32, i32, i32
  }
  func.func @transform_3(%arg0: i32) -> (i32, i32) {
    %c0_i32 = arith.constant 0 : i32
    %c0_i32_0 = arith.constant 0 : i32
    return %arg0, %c0_i32 : i32, i32
  }
}

</mosaic_0001>

<bundles_post_ra>
// kernel: tpu_custom_call.1
= control target key start
LH: loop header
LB: loop body
LE: loop exit
PB: predicated region body
PF: predicated region fallthrough
CT: control target
= control target key end

     0   :  { %8 = vsyncpa [#allocation3], 0  ;;  %s1028_s0 = inlined_call_operand.hbm [shape: f32[128,128], index: 0, kind: input, shape index: {}]   ;;  %s1029_s1 = inlined_call_operand.hbm [shape: bf16[4,128,128], index: 1, kind: input, shape index: {}]   ;;  %s1030_s2 = inlined_call_operand.hbm [shape: f32[4,1,128], index: 2, kind: input, shape index: {}]   ;;  %s1031_s3 = inlined_call_operand.hbm [shape: f32[128,128], index: 3, kind: output, shape index: {}]  }
   0x1   :  { %9 = vsyncpa [#allocation6], 0  ;;  %s28_s14 = sshll.u32 %s1029_s1, 4  ;;  %s29_s14 = int_to_ptr.hbm [resolvable:$true] %s28_s14 }
   0x2   :  { %10 = vsyncpa [#allocation4], 0  ;;  %s944_s15 = smov [#allocation5]   ;;  %s15_s19 = sshll.u32 %s1028_s0, 4  ;;  %s16_s19 = int_to_ptr.hbm [resolvable:$true] %s15_s19 }
   0x3   :  { %s30_s16 = sshll.u32 %s944_s15, 4  ;;  %s945_s20 = smov 64   ;;  %s31_s16 = int_to_ptr.vmem [resolvable:$true] %s30_s16 }
   0x4   :  { %s946_s21 = smov 4   ;;  %s947_s22 = smov [#allocation2]  }
   0x5   :  { %36 = dma.hbm_to_vmem [thread:$0]  %s29_s14, 4096, %s31_s16, [#allocation6], %s945_s20, %s945_s20, %s946_s21  }
   0x6   :  { %s17_s23 = sshll.u32 %s947_s22, 4  ;;  %s948_s24 = smov 128   ;;  %s18_s23 = int_to_ptr.vmem [resolvable:$true] %s17_s23 }
   0x7   :  { %s949_s25 = smov 8   ;;  %s41_s27 = sshll.u32 %s1030_s2, 4  ;;  %s42_s27 = int_to_ptr.hbm [resolvable:$true] %s41_s27 }
   0x8   :  { %23 = dma.hbm_to_vmem [thread:$0]  %s16_s19, 2048, %s18_s23, [#allocation3], %s948_s24, %s948_s24, %s949_s25  }
   0x9   :  { %s950_s28 = smov [#allocation7]   ;;  %s951_s29 = smov 16  }
   0xa   :  { %s43_s0 = sshll.u32 %s950_s28, 4  ;;  %s952_s30 = smov 1   ;;  %s44_s0 = int_to_ptr.vmem [resolvable:$true] %s43_s0 }
   0xb   :  { %49 = dma.hbm_to_vmem [thread:$0]  %s42_s27, 64, %s44_s0, [#allocation6], %s951_s29, %s951_s29, %s952_s30  }
   0xc   :  { %938 = dma.done.wait [#allocation3], 2048  }
   0xd   :  { %939 = vsyncadd [#allocation3], 4294965248 }
   0xe   :  { %940 = dma.done.wait [#allocation6], 4160  }
   0xf   :  { %941 = vsyncadd [#allocation6], 4294963136  ;;  %v803_v0 = vld [vmem:[#allocation5 + $0x38] sm:$0xff]  ;;  %v802_v1 = vld [vmem:[#allocation5 + $0x30] sm:$0xff]  ;;  %s953_s2 = smov [#allocation8]   ;;  %s654_s7 = sshll.u32 %s1031_s3, 4  ;;  %s655_s7 = int_to_ptr.hbm [resolvable:$true] %s654_s7 }
  0x10   :  { %154 = vmatpush.bf16.msra.mxu0 %v803_v0  ;;  %v801_v2 = vld [vmem:[#allocation5 + $0x28] sm:$0xff]  ;;  %v800_v3 = vld [vmem:[#allocation5 + $0x20] sm:$0xff]  ;;  %v799_v4 = vld [vmem:[#allocation5 + $0x18] sm:$0xff]  ;;  %s652_s4 = sshll.u32 %s953_s2, 4  ;;  %s653_s4 = int_to_ptr.vmem [resolvable:$true] %s652_s4 }
  0x11   :  { %v798_v5 = vld [vmem:[#allocation5 + $0x10] sm:$0xff]  ;;  %v797_v6 = vld [vmem:[#allocation5 + $0x8] sm:$0xff]  ;;  %v796_v7 = vld [vmem:[#allocation5] sm:$0xff] }
  0x12   :  { %v62_v8 = vld [vmem:[#allocation2] sm:$0xff]  ;;  %v63_v9 = vld [vmem:[#allocation2 + $0x8] sm:$0xff]  ;;  %v64_v11 = vld [vmem:[#allocation2 + $0x10] sm:$0xff] }
  0x13   :  { %v78_v10 = vpack.c.bf16 %v63_v9, %v62_v8  ;;  %v65_v12 = vld [vmem:[#allocation2 + $0x18] sm:$0xff]  ;;  %v66_v14 = vld [vmem:[#allocation2 + $0x20] sm:$0xff]  ;;  %v67_v15 = vld [vmem:[#allocation2 + $0x28] sm:$0xff] }
  0x14   :  { %155 = vmatpush.bf16.msra.mxu0 %v802_v1  ;;  %v79_v13 = vpack.c.bf16 %v65_v12, %v64_v11  ;;  %v80_v16 = vpack.c.bf16 %v67_v15, %v66_v14  ;;  %v68_v17 = vld [vmem:[#allocation2 + $0x30] sm:$0xff]  ;;  %v69_v18 = vld [vmem:[#allocation2 + $0x38] sm:$0xff]  ;;  %v70_v20 = vld [vmem:[#allocation2 + $0x40] sm:$0xff] }
  0x15   :  { %v81_v19 = vpack.c.bf16 %v69_v18, %v68_v17  ;;  %v71_v21 = vld [vmem:[#allocation2 + $0x48] sm:$0xff]  ;;  %v811_v23 = vld [vmem:[#allocation5 + $0x78] sm:$0xff]  ;;  %v72_v24 = vld [vmem:[#allocation2 + $0x50] sm:$0xff] }
  0x16   :  { %v82_v22 = vpack.c.bf16 %v71_v21, %v70_v20  ;;  %297 = vmatpush.bf16.msra.mxu1 %v811_v23  ;;  %v73_v25 = vld [vmem:[#allocation2 + $0x58] sm:$0xff]  ;;  %v810_v27 = vld [vmem:[#allocation5 + $0x70] sm:$0xff]  ;;  %v809_v28 = vld [vmem:[#allocation5 + $0x68] sm:$0xff] }
  0x17   :  { %v83_v26 = vpack.c.bf16 %v73_v25, %v72_v24  ;;  %v808_v29 = vld [vmem:[#allocation5 + $0x60] sm:$0xff]  ;;  %v75_v31 = vld [vmem:[#allocation2 + $0x68] sm:$0xff]  ;;  %v807_v32 = vld [vmem:[#allocation5 + $0x58] sm:$0xff] }
  0x18   :  { %156 = vmatpush.bf16.msra.mxu0 %v801_v2  ;;  %v74_v30 = vld [vmem:[#allocation2 + $0x60] sm:$0xff]  ;;  %v806_v34 = vld [vmem:[#allocation5 + $0x50] sm:$0xff]  ;;  %v805_v35 = vld [vmem:[#allocation5 + $0x48] sm:$0xff] }
  0x19   :  { %v84_v33 = vpack.c.bf16 %v75_v31, %v74_v30  ;;  %v804_v36 = vld [vmem:[#allocation5 + $0x40] sm:$0xff]  ;;  %v76_v37 = vld [vmem:[#allocation2 + $0x70] sm:$0xff]  ;;  %v77_v38 = vld [vmem:[#allocation2 + $0x78] sm:$0xff] }
  0x1a   :  { %298 = vmatpush.bf16.msra.mxu1 %v810_v27  ;;  %v85_v39 = vpack.c.bf16 %v77_v38, %v76_v37  ;;  %v986_v41 = vld [vmem:[#allocation7] ss:$0 sm:$0xff]  ;;  %v818_v20 = vld [vmem:[#allocation5 + $0xb0] sm:$0xff]  ;;  %v815_v27 = vld [vmem:[#allocation5 + $0x98] sm:$0xff] }
  0x1b   :  { %v816_v23 = vld [vmem:[#allocation5 + $0xa0] sm:$0xff]  ;;  %v814_v31 = vld [vmem:[#allocation5 + $0x90] sm:$0xff] }
  0x1c   :  { %157 = vmatpush.bf16.msra.mxu0 %v800_v3 }
  0x1e   :  { %299 = vmatpush.bf16.msra.mxu1 %v809_v28 }
  0x20   :  { %158 = vmatpush.bf16.msra.mxu0 %v799_v4 }
  0x22   :  { %300 = vmatpush.bf16.msra.mxu1 %v808_v29 }
  0x24   :  { %159 = vmatpush.bf16.msra.mxu0 %v798_v5 }
  0x26   :  { %301 = vmatpush.bf16.msra.mxu1 %v807_v32 }
  0x28   :  { %160 = vmatpush.bf16.msra.mxu0 %v797_v6 }
  0x2a   :  { %302 = vmatpush.bf16.msra.mxu1 %v806_v34  ;;  %v812_v34 = vld [vmem:[#allocation5 + $0x80] sm:$0xff] }
  0x2c   :  { %161 = vmatpush.bf16.msra.mxu0 %v796_v7 }
  0x2e   :  { %303 = vmatpush.bf16.msra.mxu1 %v805_v35 }
  0x2f   :  { %162 = vmatmul.bf16.vlgmr.msra.gmra.mxu0 %v78_v10 }
  0x32   :  { %304 = vmatpush.bf16.msra.mxu1 %v804_v36 }
  0x3f   :  { %167 = vmatmul.bf16.gmra.mxu0 %v79_v13 }
  0x4f   :  { %172 = vmatmul.bf16.gmra.mxu0 %v80_v16  ;;  %v819_v16 = vld [vmem:[#allocation5 + $0xb8] sm:$0xff] }
  0x50   :  { %440 = vmatpush.bf16.msra.mxu2 %v819_v16 }
  0x54   :  { %441 = vmatpush.bf16.msra.mxu2 %v818_v20  ;;  %v827_v20 = vld [vmem:[#allocation5 + $0xf8] sm:$0xff] }
  0x55   :  { %583 = vmatpush.bf16.msra.mxu3 %v827_v20 }
  0x5f   :  { %177 = vmatmul.bf16.gmra.mxu0 %v81_v19 }
  0x6f   :  { %182 = vmatmul.bf16.gmra.mxu0 %v82_v22  ;;  %v817_v22 = vld [vmem:[#allocation5 + $0xa8] sm:$0xff] }
  0x70   :  { %442 = vmatpush.bf16.msra.mxu2 %v817_v22  ;;  %v826_v22 = vld [vmem:[#allocation5 + $0xf0] sm:$0xff] }
  0x71   :  { %584 = vmatpush.bf16.msra.mxu3 %v826_v22 }
  0x74   :  { %443 = vmatpush.bf16.msra.mxu2 %v816_v23  ;;  %v825_v23 = vld [vmem:[#allocation5 + $0xe8] sm:$0xff] }
  0x75   :  { %585 = vmatpush.bf16.msra.mxu3 %v825_v23 }
  0x78   :  { %444 = vmatpush.bf16.msra.mxu2 %v815_v27  ;;  %v824_v27 = vld [vmem:[#allocation5 + $0xe0] sm:$0xff] }
  0x79   :  { %586 = vmatpush.bf16.msra.mxu3 %v824_v27 }
  0x7c   :  { %445 = vmatpush.bf16.msra.mxu2 %v814_v31 }
  0x7f   :  { %187 = vmatmul.bf16.gmra.mxu0 %v83_v26 }
  0x8f   :  { %192 = vmatmul.bf16.gmra.mxu0 %v84_v33  ;;  %v813_v33 = vld [vmem:[#allocation5 + $0x88] sm:$0xff] }
  0x90   :  { %446 = vmatpush.bf16.msra.mxu2 %v813_v33  ;;  %v822_v33 = vld [vmem:[#allocation5 + $0xd0] sm:$0xff] }
  0x94   :  { %447 = vmatpush.bf16.msra.mxu2 %v812_v34 }
  0x9f   :  { %197 = vmatmul.bf16.gmra.mxu0 %v85_v39 }
  0xac   :  { %v163_v40 = vpop.f32.mrf.mxu0 }
  0xad   :  { %v164_v42 = vadd.f32 %v986_v41, %v163_v40 }
  0xaf   :  { %v203_v45 = vmax.f32 %v164_v42, 0.0 }
  0xb4   :  { %v165_v43 = vpop.f32.mrf.mxu0 }
  0xb5   :  { %v166_v44 = vadd.f32 %v986_v41, %v165_v43  ;;  %v1004_v43 = vld [vmem:[#allocation7 + $0x1] ss:$0 sm:$0xff] }
  0xb7   :  { %v204_v46 = vmax.f32 %v166_v44, 0.0 }
  0xb9   :  { %v219_v47 = vpack.c.bf16 %v204_v46, %v203_v45 }
  0xbb   :  { %305 = vmatmul.bf16.vlgmr.msra.gmra.mxu1 %v219_v47 }
  0xbc   :  { %v168_v48 = vpop.f32.mrf.mxu0 }
  0xbd   :  { %v169_v49 = vadd.f32 %v986_v41, %v168_v48 }
  0xbf   :  { %v205_v52 = vmax.f32 %v169_v49, 0.0 }
  0xc4   :  { %v170_v50 = vpop.f32.mrf.mxu0 }
  0xc5   :  { %v171_v51 = vadd.f32 %v986_v41, %v170_v50 }
  0xc7   :  { %v206_v53 = vmax.f32 %v171_v51, 0.0 }
  0xc9   :  { %v220_v54 = vpack.c.bf16 %v206_v53, %v205_v52 }
  0xcb   :  { %310 = vmatmul.bf16.gmra.mxu1 %v220_v54 }
  0xcc   :  { %v173_v55 = vpop.f32.mrf.mxu0 }
  0xcd   :  { %v174_v56 = vadd.f32 %v986_v41, %v173_v55 }
  0xcf   :  { %v207_v59 = vmax.f32 %v174_v56, 0.0 }
  0xd4   :  { %v175_v57 = vpop.f32.mrf.mxu0 }
  0xd5   :  { %v176_v58 = vadd.f32 %v986_v41, %v175_v57 }
  0xd7   :  { %v208_v60 = vmax.f32 %v176_v58, 0.0 }
  0xd9   :  { %v221_v61 = vpack.c.bf16 %v208_v60, %v207_v59 }
  0xdb   :  { %315 = vmatmul.bf16.gmra.mxu1 %v221_v61 }
  0xdc   :  { %v178_v62 = vpop.f32.mrf.mxu0 }
  0xdd   :  { %v179_v63 = vadd.f32 %v986_v41, %v178_v62 }
  0xdf   :  { %v209_v2 = vmax.f32 %v179_v63, 0.0 }
  0xe4   :  { %v180_v0 = vpop.f32.mrf.mxu0 }
  0xe5   :  { %v181_v1 = vadd.f32 %v986_v41, %v180_v0 }
  0xe7   :  { %v210_v3 = vmax.f32 %v181_v1, 0.0 }
  0xe9   :  { %v222_v4 = vpack.c.bf16 %v210_v3, %v209_v2 }
  0xeb   :  { %320 = vmatmul.bf16.gmra.mxu1 %v222_v4 }
  0xec   :  { %v183_v5 = vpop.f32.mrf.mxu0 }
  0xed   :  { %v184_v6 = vadd.f32 %v986_v41, %v183_v5 }
  0xef   :  { %v211_v9 = vmax.f32 %v184_v6, 0.0 }
  0xf4   :  { %v185_v7 = vpop.f32.mrf.mxu0 }
  0xf5   :  { %v186_v8 = vadd.f32 %v986_v41, %v185_v7 }
  0xf7   :  { %v212_v10 = vmax.f32 %v186_v8, 0.0 }
  0xf9   :  { %v223_v11 = vpack.c.bf16 %v212_v10, %v211_v9 }
  0xfb   :  { %325 = vmatmul.bf16.gmra.mxu1 %v223_v11 }
  0xfc   :  { %v188_v12 = vpop.f32.mrf.mxu0 }
  0xfd   :  { %v189_v13 = vadd.f32 %v986_v41, %v188_v12 }
  0xff   :  { %v213_v17 = vmax.f32 %v189_v13, 0.0 }
 0x104   :  { %v190_v14 = vpop.f32.mrf.mxu0 }
 0x105   :  { %v191_v15 = vadd.f32 %v986_v41, %v190_v14 }
 0x107   :  { %v214_v18 = vmax.f32 %v191_v15, 0.0 }
 0x109   :  { %v224_v19 = vpack.c.bf16 %v214_v18, %v213_v17 }
 0x10b   :  { %330 = vmatmul.bf16.gmra.mxu1 %v224_v19 }
 0x10c   :  { %v193_v21 = vpop.f32.mrf.mxu0 }
 0x10d   :  { %v194_v24 = vadd.f32 %v986_v41, %v193_v21 }
 0x10f   :  { %v215_v28 = vmax.f32 %v194_v24, 0.0 }
 0x114   :  { %v195_v25 = vpop.f32.mrf.mxu0 }
 0x115   :  { %v196_v26 = vadd.f32 %v986_v41, %v195_v25 }
 0x117   :  { %v216_v29 = vmax.f32 %v196_v26, 0.0 }
 0x119   :  { %v225_v30 = vpack.c.bf16 %v216_v29, %v215_v28 }
 0x11b   :  { %335 = vmatmul.bf16.gmra.mxu1 %v225_v30 }
 0x11c   :  { %v198_v32 = vpop.f32.mrf.mxu0 }
 0x11d   :  { %v199_v35 = vadd.f32 %v986_v41, %v198_v32  ;;  %v823_v32 = vld [vmem:[#allocation5 + $0xd8] sm:$0xff] }
 0x11e   :  { %587 = vmatpush.bf16.msra.mxu3 %v823_v32 }
 0x11f   :  { %v217_v38 = vmax.f32 %v199_v35, 0.0 }
 0x122   :  { %588 = vmatpush.bf16.msra.mxu3 %v822_v33 }
 0x124   :  { %v200_v36 = vpop.f32.mrf.mxu0 }
 0x125   :  { %v201_v37 = vadd.f32 %v986_v41, %v200_v36  ;;  %v821_v36 = vld [vmem:[#allocation5 + $0xc8] sm:$0xff] }
 0x126   :  { %589 = vmatpush.bf16.msra.mxu3 %v821_v36 }
 0x127   :  { %v218_v39 = vmax.f32 %v201_v37, 0.0 }
 0x129   :  { %v226_v40 = vpack.c.bf16 %v218_v39, %v217_v38 }
 0x12b   :  { %340 = vmatmul.bf16.gmra.mxu1 %v226_v40  ;;  %v820_v40 = vld [vmem:[#allocation5 + $0xc0] sm:$0xff] }
 0x12c   :  { %590 = vmatpush.bf16.msra.mxu3 %v820_v40 }
 0x138   :  { %v306_v42 = vpop.f32.mrf.mxu1 }
 0x139   :  { %v307_v44 = vadd.f32 %v1004_v43, %v306_v42 }
 0x13b   :  { %v346_v47 = vmax.f32 %v307_v44, 0.0 }
 0x140   :  { %v308_v45 = vpop.f32.mrf.mxu1 }
 0x141   :  { %v309_v46 = vadd.f32 %v1004_v43, %v308_v45  ;;  %v840_v45 = vld [vmem:[#allocation7 + $0x2] ss:$0 sm:$0xff] }
 0x143   :  { %v347_v48 = vmax.f32 %v309_v46, 0.0 }
 0x145   :  { %v362_v49 = vpack.c.bf16 %v347_v48, %v346_v47 }
 0x147   :  { %448 = vmatmul.bf16.vlgmr.msra.gmra.mxu2 %v362_v49 }
 0x148   :  { %v311_v50 = vpop.f32.mrf.mxu1 }
 0x149   :  { %v312_v51 = vadd.f32 %v1004_v43, %v311_v50 }
 0x14b   :  { %v348_v53 = vmax.f32 %v312_v51, 0.0 }
 0x150   :  { %v313_v41 = vpop.f32.mrf.mxu1 }
 0x151   :  { %v314_v52 = vadd.f32 %v1004_v43, %v313_v41 }
 0x153   :  { %v349_v54 = vmax.f32 %v314_v52, 0.0 }
 0x155   :  { %v363_v55 = vpack.c.bf16 %v349_v54, %v348_v53 }
 0x157   :  { %453 = vmatmul.bf16.gmra.mxu2 %v363_v55 }
 0x158   :  { %v316_v56 = vpop.f32.mrf.mxu1 }
 0x159   :  { %v317_v57 = vadd.f32 %v1004_v43, %v316_v56 }
 0x15b   :  { %v350_v60 = vmax.f32 %v317_v57, 0.0 }
 0x160   :  { %v318_v58 = vpop.f32.mrf.mxu1 }
 0x161   :  { %v319_v59 = vadd.f32 %v1004_v43, %v318_v58 }
 0x163   :  { %v351_v61 = vmax.f32 %v319_v59, 0.0 }
 0x165   :  { %v364_v62 = vpack.c.bf16 %v351_v61, %v350_v60 }
 0x167   :  { %458 = vmatmul.bf16.gmra.mxu2 %v364_v62 }
 0x168   :  { %v321_v63 = vpop.f32.mrf.mxu1 }
 0x169   :  { %v322_v0 = vadd.f32 %v1004_v43, %v321_v63 }
 0x16b   :  { %v352_v3 = vmax.f32 %v322_v0, 0.0 }
 0x170   :  { %v323_v1 = vpop.f32.mrf.mxu1 }
 0x171   :  { %v324_v2 = vadd.f32 %v1004_v43, %v323_v1 }
 0x173   :  { %v353_v4 = vmax.f32 %v324_v2, 0.0 }
 0x175   :  { %v365_v5 = vpack.c.bf16 %v353_v4, %v352_v3 }
 0x177   :  { %463 = vmatmul.bf16.gmra.mxu2 %v365_v5 }
 0x178   :  { %v326_v6 = vpop.f32.mrf.mxu1 }
 0x179   :  { %v327_v7 = vadd.f32 %v1004_v43, %v326_v6 }
 0x17b   :  { %v354_v10 = vmax.f32 %v327_v7, 0.0 }
 0x180   :  { %v328_v8 = vpop.f32.mrf.mxu1 }
 0x181   :  { %v329_v9 = vadd.f32 %v1004_v43, %v328_v8 }
 0x183   :  { %v355_v11 = vmax.f32 %v329_v9, 0.0 }
 0x185   :  { %v366_v12 = vpack.c.bf16 %v355_v11, %v354_v10 }
 0x187   :  { %468 = vmatmul.bf16.gmra.mxu2 %v366_v12 }
 0x188   :  { %v331_v13 = vpop.f32.mrf.mxu1 }
 0x189   :  { %v332_v14 = vadd.f32 %v1004_v43, %v331_v13 }
 0x18b   :  { %v356_v17 = vmax.f32 %v332_v14, 0.0 }
 0x190   :  { %v333_v15 = vpop.f32.mrf.mxu1 }
 0x191   :  { %v334_v16 = vadd.f32 %v1004_v43, %v333_v15 }
 0x193   :  { %v357_v18 = vmax.f32 %v334_v16, 0.0 }
 0x195   :  { %v367_v19 = vpack.c.bf16 %v357_v18, %v356_v17 }
 0x197   :  { %473 = vmatmul.bf16.gmra.mxu2 %v367_v19 }
 0x198   :  { %v336_v21 = vpop.f32.mrf.mxu1 }
 0x199   :  { %v337_v24 = vadd.f32 %v1004_v43, %v336_v21 }
 0x19b   :  { %v358_v28 = vmax.f32 %v337_v24, 0.0 }
 0x1a0   :  { %v338_v25 = vpop.f32.mrf.mxu1 }
 0x1a1   :  { %v339_v26 = vadd.f32 %v1004_v43, %v338_v25 }
 0x1a3   :  { %v359_v29 = vmax.f32 %v339_v26, 0.0 }
 0x1a5   :  { %v368_v30 = vpack.c.bf16 %v359_v29, %v358_v28 }
 0x1a7   :  { %478 = vmatmul.bf16.gmra.mxu2 %v368_v30 }
 0x1a8   :  { %v341_v31 = vpop.f32.mrf.mxu1 }
 0x1a9   :  { %v342_v34 = vadd.f32 %v1004_v43, %v341_v31 }
 0x1ab   :  { %v360_v38 = vmax.f32 %v342_v34, 0.0 }
 0x1b0   :  { %v343_v35 = vpop.f32.mrf.mxu1 }
 0x1b1   :  { %v344_v37 = vadd.f32 %v1004_v43, %v343_v35  ;;  %v841_v35 = vld [vmem:[#allocation7 + $0x3] ss:$0 sm:$0xff] }
 0x1b3   :  { %v361_v39 = vmax.f32 %v344_v37, 0.0 }
 0x1b5   :  { %v369_v42 = vpack.c.bf16 %v361_v39, %v360_v38 }
 0x1b7   :  { %483 = vmatmul.bf16.gmra.mxu2 %v369_v42 }
 0x1ca   :  { %v449_v44 = vpop.f32.mrf.mxu2 }
 0x1cb   :  { %v450_v46 = vadd.f32 %v840_v45, %v449_v44 }
 0x1cd   :  { %v489_v49 = vmax.f32 %v450_v46, 0.0 }
 0x1d2   :  { %v451_v47 = vpop.f32.mrf.mxu2 }
 0x1d3   :  { %v452_v48 = vadd.f32 %v840_v45, %v451_v47 }
 0x1d5   :  { %v490_v50 = vmax.f32 %v452_v48, 0.0 }
 0x1d7   :  { %v505_v51 = vpack.c.bf16 %v490_v50, %v489_v49 }
 0x1d9   :  { %591 = vmatmul.bf16.vlgmr.msra.gmra.mxu3 %v505_v51 }
 0x1da   :  { %v454_v41 = vpop.f32.mrf.mxu2 }
 0x1db   :  { %v455_v52 = vadd.f32 %v840_v45, %v454_v41 }
 0x1dd   :  { %v491_v54 = vmax.f32 %v455_v52, 0.0 }
 0x1e2   :  { %v456_v53 = vpop.f32.mrf.mxu2 }
 0x1e3   :  { %v457_v43 = vadd.f32 %v840_v45, %v456_v53 }
 0x1e5   :  { %v492_v55 = vmax.f32 %v457_v43, 0.0 }
 0x1e7   :  { %v506_v56 = vpack.c.bf16 %v492_v55, %v491_v54 }
 0x1e9   :  { %596 = vmatmul.bf16.gmra.mxu3 %v506_v56 }
 0x1ea   :  { %v459_v57 = vpop.f32.mrf.mxu2 }
 0x1eb   :  { %v460_v58 = vadd.f32 %v840_v45, %v459_v57 }
 0x1ed   :  { %v493_v61 = vmax.f32 %v460_v58, 0.0 }
 0x1f2   :  { %v461_v59 = vpop.f32.mrf.mxu2 }
 0x1f3   :  { %v462_v60 = vadd.f32 %v840_v45, %v461_v59 }
 0x1f5   :  { %v494_v62 = vmax.f32 %v462_v60, 0.0 }
 0x1f7   :  { %v507_v63 = vpack.c.bf16 %v494_v62, %v493_v61 }
 0x1f9   :  { %601 = vmatmul.bf16.gmra.mxu3 %v507_v63 }
 0x1fa   :  { %v464_v0 = vpop.f32.mrf.mxu2 }
 0x1fb   :  { %v465_v1 = vadd.f32 %v840_v45, %v464_v0 }
 0x1fd   :  { %v495_v4 = vmax.f32 %v465_v1, 0.0 }
 0x202   :  { %v466_v2 = vpop.f32.mrf.mxu2 }
 0x203   :  { %v467_v3 = vadd.f32 %v840_v45, %v466_v2 }
 0x205   :  { %v496_v5 = vmax.f32 %v467_v3, 0.0 }
 0x207   :  { %v508_v6 = vpack.c.bf16 %v496_v5, %v495_v4 }
 0x209   :  { %606 = vmatmul.bf16.gmra.mxu3 %v508_v6 }
 0x20a   :  { %v469_v7 = vpop.f32.mrf.mxu2 }
 0x20b   :  { %v470_v8 = vadd.f32 %v840_v45, %v469_v7 }
 0x20d   :  { %v497_v11 = vmax.f32 %v470_v8, 0.0 }
 0x212   :  { %v471_v9 = vpop.f32.mrf.mxu2 }
 0x213   :  { %v472_v10 = vadd.f32 %v840_v45, %v471_v9 }
 0x215   :  { %v498_v12 = vmax.f32 %v472_v10, 0.0 }
 0x217   :  { %v509_v13 = vpack.c.bf16 %v498_v12, %v497_v11 }
 0x219   :  { %611 = vmatmul.bf16.gmra.mxu3 %v509_v13 }
 0x21a   :  { %v474_v14 = vpop.f32.mrf.mxu2 }
 0x21b   :  { %v475_v15 = vadd.f32 %v840_v45, %v474_v14 }
 0x21d   :  { %v499_v18 = vmax.f32 %v475_v15, 0.0 }
 0x222   :  { %v476_v16 = vpop.f32.mrf.mxu2 }
 0x223   :  { %v477_v17 = vadd.f32 %v840_v45, %v476_v16 }
 0x225   :  { %v500_v19 = vmax.f32 %v477_v17, 0.0 }
 0x227   :  { %v510_v20 = vpack.c.bf16 %v500_v19, %v499_v18 }
 0x229   :  { %616 = vmatmul.bf16.gmra.mxu3 %v510_v20 }
 0x22a   :  { %v479_v21 = vpop.f32.mrf.mxu2 }
 0x22b   :  { %v480_v22 = vadd.f32 %v840_v45, %v479_v21 }
 0x22d   :  { %v501_v25 = vmax.f32 %v480_v22, 0.0 }
 0x232   :  { %v481_v23 = vpop.f32.mrf.mxu2 }
 0x233   :  { %v482_v24 = vadd.f32 %v840_v45, %v481_v23 }
 0x235   :  { %v502_v26 = vmax.f32 %v482_v24, 0.0 }
 0x237   :  { %v511_v27 = vpack.c.bf16 %v502_v26, %v501_v25 }
 0x239   :  { %621 = vmatmul.bf16.gmra.mxu3 %v511_v27 }
 0x23a   :  { %v484_v28 = vpop.f32.mrf.mxu2 }
 0x23b   :  { %v485_v29 = vadd.f32 %v840_v45, %v484_v28 }
 0x23d   :  { %v503_v32 = vmax.f32 %v485_v29, 0.0 }
 0x242   :  { %v486_v30 = vpop.f32.mrf.mxu2 }
 0x243   :  { %v487_v31 = vadd.f32 %v840_v45, %v486_v30 }
 0x245   :  { %v504_v33 = vmax.f32 %v487_v31, 0.0 }
 0x247   :  { %v512_v34 = vpack.c.bf16 %v504_v33, %v503_v32 }
 0x249   :  { %626 = vmatmul.bf16.gmra.mxu3 %v512_v34 }
 0x25c   :  { %v592_v36 = vpop.f32.mrf.mxu3 }
 0x25d   :  { %v593_v37 = vadd.f32 %v841_v35, %v592_v36 }
 0x25f   :  { %632 = vst [vmem:[#allocation8] sm:$0xff] %v593_v37 }
 0x264   :  { %v594_v38 = vpop.f32.mrf.mxu3 }
 0x265   :  { %v595_v39 = vadd.f32 %v841_v35, %v594_v38 }
 0x267   :  { %633 = vst [vmem:[#allocation8 + $0x8] sm:$0xff] %v595_v39 }
 0x26c   :  { %v597_v40 = vpop.f32.mrf.mxu3 }
 0x26d   :  { %v598_v42 = vadd.f32 %v841_v35, %v597_v40 }
 0x26f   :  { %634 = vst [vmem:[#allocation8 + $0x10] sm:$0xff] %v598_v42 }
 0x274   :  { %v599_v44 = vpop.f32.mrf.mxu3 }
 0x275   :  { %v600_v46 = vadd.f32 %v841_v35, %v599_v44 }
 0x277   :  { %635 = vst [vmem:[#allocation8 + $0x18] sm:$0xff] %v600_v46 }
 0x27c   :  { %v602_v47 = vpop.f32.mrf.mxu3 }
 0x27d   :  { %v603_v48 = vadd.f32 %v841_v35, %v602_v47 }
 0x27f   :  { %636 = vst [vmem:[#allocation8 + $0x20] sm:$0xff] %v603_v48 }
 0x284   :  { %v604_v45 = vpop.f32.mrf.mxu3 }
 0x285   :  { %v605_v49 = vadd.f32 %v841_v35, %v604_v45 }
 0x287   :  { %637 = vst [vmem:[#allocation8 + $0x28] sm:$0xff] %v605_v49 }
 0x28c   :  { %v607_v50 = vpop.f32.mrf.mxu3 }
 0x28d   :  { %v608_v51 = vadd.f32 %v841_v35, %v607_v50 }
 0x28f   :  { %638 = vst [vmem:[#allocation8 + $0x30] sm:$0xff] %v608_v51 }
 0x294   :  { %v609_v41 = vpop.f32.mrf.mxu3 }
 0x295   :  { %v610_v52 = vadd.f32 %v841_v35, %v609_v41 }
 0x297   :  { %639 = vst [vmem:[#allocation8 + $0x38] sm:$0xff] %v610_v52 }
 0x29c   :  { %v612_v53 = vpop.f32.mrf.mxu3 }
 0x29d   :  { %v613_v43 = vadd.f32 %v841_v35, %v612_v53 }
 0x29f   :  { %640 = vst [vmem:[#allocation8 + $0x40] sm:$0xff] %v613_v43 }
 0x2a4   :  { %v614_v54 = vpop.f32.mrf.mxu3 }
 0x2a5   :  { %v615_v55 = vadd.f32 %v841_v35, %v614_v54 }
 0x2a7   :  { %641 = vst [vmem:[#allocation8 + $0x48] sm:$0xff] %v615_v55 }
 0x2ac   :  { %v617_v56 = vpop.f32.mrf.mxu3 }
 0x2ad   :  { %v618_v57 = vadd.f32 %v841_v35, %v617_v56 }
 0x2af   :  { %642 = vst [vmem:[#allocation8 + $0x50] sm:$0xff] %v618_v57 }
 0x2b4   :  { %v619_v58 = vpop.f32.mrf.mxu3 }
 0x2b5   :  { %v620_v59 = vadd.f32 %v841_v35, %v619_v58 }
 0x2b7   :  { %643 = vst [vmem:[#allocation8 + $0x58] sm:$0xff] %v620_v59 }
 0x2bc   :  { %v622_v60 = vpop.f32.mrf.mxu3 }
 0x2bd   :  { %v623_v61 = vadd.f32 %v841_v35, %v622_v60 }
 0x2bf   :  { %644 = vst [vmem:[#allocation8 + $0x60] sm:$0xff] %v623_v61 }
 0x2c4   :  { %v624_v62 = vpop.f32.mrf.mxu3 }
 0x2c5   :  { %v625_v63 = vadd.f32 %v841_v35, %v624_v62 }
 0x2c7   :  { %645 = vst [vmem:[#allocation8 + $0x68] sm:$0xff] %v625_v63 }
 0x2cc   :  { %v627_v0 = vpop.f32.mrf.mxu3 }
 0x2cd   :  { %v628_v1 = vadd.f32 %v841_v35, %v627_v0 }
 0x2cf   :  { %646 = vst [vmem:[#allocation8 + $0x70] sm:$0xff] %v628_v1 }
 0x2d4   :  { %v629_v2 = vpop.f32.mrf.mxu3 }
 0x2d5   :  { %v630_v3 = vadd.f32 %v841_v35, %v629_v2 }
 0x2d7   :  { %647 = vst [vmem:[#allocation8 + $0x78] sm:$0xff] %v630_v3 }
 0x2d8   :  { %660 = dma.vmem_to_hbm [thread:$0]  %s653_s4, 2048, %s655_s7, [#allocation4], %s948_s24, %s948_s24, %s949_s25  }
 0x2d9   :  { %942 = dma.done.wait [#allocation4], 2048  }
 0x2da   :  { %943 = vsyncadd [#allocation4], 4294965248 }
 0x2db   :  { %665 = vsyncpa [#allocation3], 1 }
 0x2dc   :  { %666 = vsyncpa [#allocation6], 1 }
 0x2dd   :  { %667 = vsyncpa [#allocation4], 1 }

</bundles_post_ra>
